<compile_context>
chip_gen: v7x
topology: tpu7x:2x2x1
jax: 0.10.0
libtpu: 0.0.40
codegen_flags: <defaults>
</compile_context>

<pallas_src>
import functools

import jax
import jax.numpy as jnp
from jax import lax
from jax.experimental import pallas as pl
from jax.experimental.pallas import tpu as pltpu

LANES = 128              # vreg lane width
SUBLANES = 8             # f32 vreg sublane count
TILE = SUBLANES * LANES  # 1024 elements: one (8,128) f32 tile
TM_MAX = 2048            # rows per grid step -> 1 MiB / input block at f32


def _mse_partial_kernel(pred_ref, targ_ref, out_ref, *, tm, rows, bpc, needs_mask):
    """Accumulate sum((pred-targ)^2) of one (tm,128) tile into an (8,128) slab."""
    c = pl.program_id(0)  # core-split axis ("parallel")
    i = pl.program_id(1)  # reduction axis ("arbitrary")

    @pl.when(i == 0)
    def _():
        out_ref[...] = jnp.zeros_like(out_ref)

    d = pred_ref[...].astype(jnp.float32) - targ_ref[...].astype(jnp.float32)
    sq = d * d

    if needs_mask:
        # Zero rows past the end of the valid [0, rows) range. This covers both
        # the partially out-of-bounds last block and fully-replicated (clamped)
        # blocks on the core-split axis. `tm`, `rows`, `bpc` are static ints.
        blk = c * bpc + i                                     # unclamped block id
        row_ids = lax.broadcasted_iota(jnp.int32, (tm, 1), 0)
        valid = (blk * tm + row_ids) < rows
        sq = jnp.where(valid, sq, 0.0)

    # Fold (tm,128) -> (8,128) with pure VPU vector adds (no XLU / scalar path),
    # and accumulate into the resident output block.
    out_ref[...] += jnp.sum(sq.reshape(tm // SUBLANES, SUBLANES, LANES), axis=0)


@jax.jit
def mse_loss(prediction, target, interference=None):
    """Equivalent of nn.MSELoss()(prediction, target); `interference` unused."""
    del interference  # not used by the reference module's forward
    assert prediction.shape == target.shape

    n_elem = prediction.size
    out_dtype = prediction.dtype
    if n_elem == 0:
        # Matches torch's nan-on-empty mean; avoids a zero-step grid.
        return jnp.array(jnp.nan, dtype=out_dtype)

    pred_flat = prediction.reshape(-1)
    targ_flat = target.reshape(-1)

    # Align only to the next (8,128) tile (<= 1023 zeros). Zeros contribute 0 to
    # the sum. For the common case n_elem % 1024 == 0 this is a free reshape,
    # not an extra HBM pass.
    pad = (-n_elem) % TILE
    if pad:
        pred_flat = jnp.pad(pred_flat, (0, pad))
        targ_flat = jnp.pad(targ_flat, (0, pad))

    rows = (n_elem + pad) // LANES          # multiple of 8
    pred2d = pred_flat.reshape(rows, LANES)
    targ2d = targ_flat.reshape(rows, LANES)

    tm = min(TM_MAX, rows)                  # multiple of 8, never exceeds the array
    n_blocks = (rows + tm - 1) // tm
    nc = 2 if n_blocks > 1 else 1           # 2-way core split (v7x); harmless on 1-TC chips
    bpc = (n_blocks + nc - 1) // nc         # blocks per core
    needs_mask = (rows % tm != 0) or (nc * bpc != n_blocks)

    if nc * bpc == n_blocks:
        def in_map(c, i):
            return (c * bpc + i, 0)
    else:
        def in_map(c, i):
            # Clamp so replicated tail programs never issue an OOB block DMA;
            # their contribution is masked to zero inside the kernel.
            return (jnp.minimum(c * bpc + i, n_blocks - 1), 0)

    kernel = functools.partial(
        _mse_partial_kernel, tm=tm, rows=rows, bpc=bpc, needs_mask=needs_mask)

    partials = pl.pallas_call(
        kernel,
        out_shape=jax.ShapeDtypeStruct((nc * SUBLANES, LANES), jnp.float32),
        grid_spec=pltpu.PrefetchScalarGridSpec(
            num_scalar_prefetch=0,
            grid=(nc, bpc),
            in_specs=[
                pl.BlockSpec((tm, LANES), in_map),
                pl.BlockSpec((tm, LANES), in_map),
            ],
            out_specs=pl.BlockSpec((SUBLANES, LANES), lambda c, i: (c, 0)),
        ),
        compiler_params=pltpu.CompilerParams(
            dimension_semantics=("parallel", "arbitrary")),
    )(pred2d, targ2d)

    # Final cross-lane/sublane reduce + mean (divide by the true element count).
    sum_sq = jnp.sum(partials)
    return (sum_sq / jnp.float32(n_elem)).astype(out_dtype)


if __name__ == "__main__":
    key = jax.random.PRNGKey(0)

    # Primary small test: NCHW [2, 4, 16, 16].
    k1, k2, k3 = jax.random.split(key, 3)
    B, C, H, W = 2, 4, 16, 16
    prediction = jax.random.normal(k1, (B, C, H, W), dtype=jnp.float32)
    target = jax.random.normal(k2, (B, C, H, W), dtype=jnp.float32)
    interference = jax.random.normal(k3, (B, C, H, W), dtype=jnp.float32)

    loss = jax.block_until_ready(mse_loss(prediction, target, interference))
    ref = jnp.mean((prediction - target) ** 2)
    assert jnp.allclose(loss, ref, rtol=1e-4, atol=1e-6), (loss, ref)

    # Secondary checks: (a) multi-block grid with a partial tail block
    # (exercises the 2-way core split + in-kernel masking), (b) a size not
    # divisible by 1024 (exercises the small tile-alignment pad).
    for shape in [(4, 8, 96, 96), (3, 5, 7, 11)]:
        ka, kb = jax.random.split(jax.random.fold_in(key, sum(shape)), 2)
        p = jax.random.normal(ka, shape, dtype=jnp.float32)
        t = jax.random.normal(kb, shape, dtype=jnp.float32)
        got = jax.block_until_ready(mse_loss(p, t, None))
        want = jnp.mean((p - t) ** 2)
        assert jnp.allclose(got, want, rtol=1e-4, atol=1e-6), (shape, got, want)

    print("KERNEL_OK")
</pallas_src>

<mosaic_0001>
module attributes {stable_mosaic.version = 11 : i64} {
  func.func @_mse_partial_kernel(%arg0: i32, %arg1: i32, %arg2: memref<16x128xf32, #tpu.memory_space<vmem>>, %arg3: memref<16x128xf32, #tpu.memory_space<vmem>>, %arg4: memref<8x128xf32, #tpu.memory_space<vmem>>) attributes {dimension_semantics = [#tpu.dimension_semantics<parallel>, #tpu.dimension_semantics<arbitrary>], iteration_bounds = array<i64: 1, 1>, scalar_prefetch = 0 : i64, scratch_operands = 0 : i64, tpu.core_type = #tpu.core_type<tc>, window_params = [{transform_indices = @transform_0, window_bounds = array<i64: 16, 128>}, {transform_indices = @transform_1, window_bounds = array<i64: 16, 128>}, {transform_indices = @transform_2, window_bounds = array<i64: 8, 128>}]} {
    %c0_i32 = arith.constant 0 : i32
    %0 = arith.cmpi eq, %arg1, %c0_i32 : i32
    %1 = arith.extui %0 : i1 to i32
    %c0_i32_0 = arith.constant 0 : i32
    %2 = arith.cmpi ne, %1, %c0_i32_0 : i32
    scf.if %2 {
      %cst_8 = arith.constant 0.000000e+00 : f32
      %12 = vector.broadcast %cst_8 : f32 to vector<8x128xf32>
      %c0_9 = arith.constant 0 : index
      %c0_10 = arith.constant 0 : index
      %13 = vector.load %arg4[%c0_9, %c0_10] : memref<8x128xf32, #tpu.memory_space<vmem>>, vector<8x128xf32>
      tpu.vector_store %arg4[%c0_9, %c0_10], %12 {strides = array<i32>} : memref<8x128xf32, #tpu.memory_space<vmem>>, vector<8x128xf32>,
    } else {
    }
    %c0 = arith.constant 0 : index
    %c0_1 = arith.constant 0 : index
    %3 = vector.load %arg2[%c0, %c0_1] : memref<16x128xf32, #tpu.memory_space<vmem>>, vector<16x128xf32>
    %c0_2 = arith.constant 0 : index
    %c0_3 = arith.constant 0 : index
    %4 = vector.load %arg3[%c0_2, %c0_3] : memref<16x128xf32, #tpu.memory_space<vmem>>, vector<16x128xf32>
    %5 = arith.subf %3, %4 : vector<16x128xf32>
    %6 = arith.mulf %5, %5 : vector<16x128xf32>
    %c0_4 = arith.constant 0 : index
    %c0_5 = arith.constant 0 : index
    %7 = vector.load %arg4[%c0_4, %c0_5] : memref<8x128xf32, #tpu.memory_space<vmem>>, vector<8x128xf32>
    %8 = vector.shape_cast %6 : vector<16x128xf32> to vector<2x8x128xf32>
    %cst = arith.constant dense<0.000000e+00> : vector<8x128xf32>
    %9 = vector.multi_reduction <add>, %8, %cst [0] : vector<2x8x128xf32> to vector<8x128xf32>
    %10 = arith.addf %7, %9 : vector<8x128xf32>
    %c0_6 = arith.constant 0 : index
    %c0_7 = arith.constant 0 : index
    %11 = vector.load %arg4[%c0_6, %c0_7] : memref<8x128xf32, #tpu.memory_space<vmem>>, vector<8x128xf32>
    tpu.vector_store %arg4[%c0_6, %c0_7], %10 {strides = array<i32>} : memref<8x128xf32, #tpu.memory_space<vmem>>, vector<8x128xf32>,
    return
  }
  func.func @transform_0(%arg0: i32, %arg1: i32) -> (i32, i32) {
    %c1_i32 = arith.constant 1 : i32
    %0 = arith.muli %arg0, %c1_i32 : i32
    %1 = arith.addi %0, %arg1 : i32
    %c0_i32 = arith.constant 0 : i32
    %c0_i32_0 = arith.constant 0 : i32
    return %1, %c0_i32 : i32, i32
  }
  func.func @transform_1(%arg0: i32, %arg1: i32) -> (i32, i32) {
    %c1_i32 = arith.constant 1 : i32
    %0 = arith.muli %arg0, %c1_i32 : i32
    %1 = arith.addi %0, %arg1 : i32
    %c0_i32 = arith.constant 0 : i32
    %c0_i32_0 = arith.constant 0 : i32
    return %1, %c0_i32 : i32, i32
  }
  func.func @transform_2(%arg0: i32, %arg1: i32) -> (i32, i32) {
    %c0_i32 = arith.constant 0 : i32
    %c0_i32_0 = arith.constant 0 : i32
    return %arg0, %c0_i32 : i32, i32
  }
}

</mosaic_0001>

<bundles_post_ra>
// kernel: mse_loss.1
= control target key start
LH: loop header
LB: loop body
LE: loop exit
PB: predicated region body
PF: predicated region fallthrough
CT: control target
= control target key end

     0   :  { %s119_s0 = inlined_call_operand.vmem [shape: f32[16,128], index: 0, kind: input, shape index: {}]   ;;  %s120_s1 = inlined_call_operand.vmem [shape: f32[16,128], index: 1, kind: input, shape index: {}]   ;;  %s121_s2 = inlined_call_operand.vmem [shape: f32[8,128], index: 2, kind: output, shape index: {}]  }
   0x1   :  { %v60_v0 = vld [vmem:[%s119_s0] sm:$0xff]  ;;  %v61_v1 = vld [vmem:[%s119_s0 + $0x8] sm:$0xff] }
   0x2   :  { %v62_v2 = vld [vmem:[%s120_s1] sm:$0xff]  ;;  %v63_v3 = vld [vmem:[%s120_s1 + $0x8] sm:$0xff] }
   0x3   :  { %v64_v4 = vsub.f32 %v60_v0, %v62_v2  ;;  %v65_v5 = vsub.f32 %v61_v1, %v63_v3 }
   0x5   :  { %v66_v6 = vmul.f32 %v64_v4, %v64_v4  ;;  %v67_v7 = vmul.f32 %v65_v5, %v65_v5 }
   0x7   :  { %v69_v8 = vadd.f32 %v67_v7, %v66_v6 }
   0x9   :  { %71 = vst [vmem:[%s121_s2] sm:$0xff] %v69_v8 }

</bundles_post_ra>
